<compile_context>
chip_gen: v7x
topology: tpu7x:2x2x1
jax: 0.10.0
libtpu: 0.0.40
codegen_flags: <defaults>
</compile_context>

<pallas_src>
import math
from typing import NamedTuple, Optional

import jax
import jax.numpy as jnp
from jax.experimental import pallas as pl
from jax.experimental.pallas import tpu as pltpu


# --------------------------------------------------------------------------- #
# Small helpers
# --------------------------------------------------------------------------- #
def _round_up(x: int, m: int) -> int:
    return (x + m - 1) // m * m


def _itemsize(dtype) -> int:
    return jnp.dtype(dtype).itemsize


def _sublane(dtype) -> int:
    # Packed-sublane multiple of the native tile: 8 for f32, 16 for bf16, 32 for i8/fp8.
    return max(8, 32 // _itemsize(dtype))


def _lane_tile(n: int, target: int) -> int:
    """Lane-dim (last-dim) tile: `target` (multiple of 256 -> feeds the 256-wide
    MXU of v6e/v7x) for large dims, otherwise the whole dim padded to the
    128-lane minimum (avoids masked partial stores with minimal padding)."""
    if n >= target:
        return target
    return _round_up(n, 128)


def _vmem_capacity_bytes() -> int:
    try:
        info = pltpu.get_tpu_info()
        cap = getattr(info, "vmem_capacity_bytes", None)
        if cap:
            return int(cap)
    except Exception:
        pass
    return 64 << 20  # conservative: v7x per-TensorCore VMEM


def _vmem_budget_bytes() -> int:
    # Leave more than half of VMEM for pipelining slack / compiler scratch; the
    # 45% figure keeps a v6e-sized config clear of v7x's 64 MiB per-core ceiling.
    cap = _vmem_capacity_bytes()
    return min(int(cap * 0.45), 56 << 20)


# --------------------------------------------------------------------------- #
# Kernels
# --------------------------------------------------------------------------- #
def _make_linear_kernel(has_bias: bool, use_scratch: bool):
    """Tiled x @ W_T matmul with f32 accumulation.

    Grid is (M-tiles, N-tiles, K-tiles) with the reduction axis last.  The
    accumulator is either the resident output block (f32 outputs) or an f32
    VMEM scratch (sub-f32 outputs).  It is initialized at k == 0 — directly
    with the broadcast bias when present — and, when a scratch is used, cast
    into the output at the final k step.
    """

    def kernel(*refs):
        if has_bias:
            x_ref, w_ref, b_ref = refs[:3]
            rest = refs[3:]
        else:
            x_ref, w_ref = refs[:2]
            b_ref = None
            rest = refs[2:]
        if use_scratch:
            o_ref, acc_ref = rest
        else:
            (o_ref,) = rest
            acc_ref = o_ref  # f32 output block doubles as the accumulator

        @pl.when(pl.program_id(2) == 0)
        def _init():
            if has_bias:
                acc_ref[...] = jnp.broadcast_to(b_ref[...], acc_ref.shape)
            else:
                acc_ref[...] = jnp.zeros_like(acc_ref)

        # (tm, tk) @ (tk, tn) -> MXU, accumulate in f32.
        acc_ref[...] += jnp.dot(
            x_ref[...], w_ref[...], preferred_element_type=jnp.float32
        )

        if use_scratch:

            @pl.when(pl.program_id(2) == pl.num_programs(2) - 1)
            def _finalize():
                o_ref[...] = acc_ref[...].astype(o_ref.dtype)

    return kernel


# --------------------------------------------------------------------------- #
# Weight preparation (done once per layer) and the forward call
# --------------------------------------------------------------------------- #
class PreparedLinear(NamedTuple):
    w_t: jax.Array            # (Kp, Np) pre-transposed, pre-cast, pre-padded weight
    b: Optional[jax.Array]    # (1, Np) f32 bias or None
    n: int                    # logical out_features
    k: int                    # logical in_features
    tn: int                   # output-feature tile
    tk: int                   # reduction tile


def prepare_linear(weight, bias=None, compute_dtype=None, *, tn=None, tk=None):
    """Cast / transpose / pad the weight ONCE so repeated forwards do no extra
    HBM traffic for weight preparation."""
    n, k = weight.shape
    cdt = jnp.dtype(compute_dtype) if compute_dtype is not None else jnp.dtype(weight.dtype)

    if tn is None:
        tn = _lane_tile(n, 1024 if cdt.itemsize <= 2 else 512)
    if tk is None:
        tk = _lane_tile(k, 1024)

    np_, kp = _round_up(n, tn), _round_up(k, tk)

    w_t = weight.astype(cdt).T  # (K, N): plain jnp.dot in the kernel, native MXU
    if (kp, np_) != (k, n):
        w_t = jnp.pad(w_t, ((0, kp - k), (0, np_ - n)))

    b2d = None
    if bias is not None:
        b2d = bias.astype(jnp.float32).reshape(1, n)  # keep f32 through accumulation
        if np_ != n:
            b2d = jnp.pad(b2d, ((0, 0), (0, np_ - n)))

    return PreparedLinear(w_t=w_t, b=b2d, n=n, k=k, tn=tn, tk=tk)


def linear_apply(x, prep: PreparedLinear, *, tm=512):
    """x: (..., in_features) -> (..., out_features), using a prepared weight."""
    n, k = prep.n, prep.k
    if x.shape[-1] != k:
        raise ValueError(f"last dim of x ({x.shape[-1]}) != in_features ({k})")

    orig_shape = x.shape
    out_dtype = x.dtype
    cdt = prep.w_t.dtype
    in_sz, out_sz = _itemsize(cdt), _itemsize(out_dtype)
    sub = _sublane(cdt)

    x2d = x.reshape(-1, k).astype(cdt)
    m = x2d.shape[0]
    kp, np_ = prep.w_t.shape
    tn, tk = prep.tn, prep.tk

    # f32 outputs accumulate straight into the resident output block.
    use_scratch = jnp.dtype(out_dtype) != jnp.dtype(jnp.float32)

    tm = min(tm, _round_up(m, sub))

    def vmem_usage(tm_, tn_, tk_):
        u = 2 * (tm_ * tk_ + tn_ * tk_) * in_sz + 2 * tm_ * tn_ * out_sz
        if use_scratch:
            u += tm_ * tn_ * 4
        return u

    # Shrink tiles until the (double-buffered) working set fits the budget.
    budget = _vmem_budget_bytes()
    while vmem_usage(tm, tn, tk) > budget:
        if tk > 256 and (tk // 2) % 128 == 0:
            tk //= 2
        elif tm > sub and (tm // 2) % sub == 0:
            tm //= 2
        elif tn > 128 and (tn // 2) % 128 == 0:
            tn //= 2
        else:
            break

    # Make sure large problems expose >= 2 parallel (i, j) tiles for v7x's 2 TCs.
    mp = _round_up(m, tm)
    if (mp // tm) * (np_ // tn) < 2:
        if tm >= 512 and (tm // 2) % sub == 0:
            tm //= 2
        elif tn >= 512 and (tn // 2) % 128 == 0:
            tn //= 2
    mp = _round_up(m, tm)

    if (mp, kp) != (m, k):
        x2d = jnp.pad(x2d, ((0, mp - m), (0, kp - k)))

    grid = (mp // tm, np_ // tn, kp // tk)
    gm, gn, gk = grid

    in_specs = [
        pl.BlockSpec((tm, tk), lambda i, j, kk: (i, kk)),   # activation tile
        pl.BlockSpec((tk, tn), lambda i, j, kk: (kk, j)),   # W^T tile (K, N)
    ]
    args = [x2d, prep.w_t]
    has_bias = prep.b is not None
    if has_bias:
        in_specs.append(pl.BlockSpec((1, tn), lambda i, j, kk: (0, j)))
        args.append(prep.b)

    scratch = [pltpu.VMEM((tm, tn), jnp.float32)] if use_scratch else []

    cap = _vmem_capacity_bytes()
    vmem_limit = int(min(max(2 * vmem_usage(tm, tn, tk), 32 << 20), cap))

    # Truthful streamed-bytes estimate: x re-read per N-tile, W re-read per M-tile.
    cost = pl.CostEstimate(
        flops=2 * m * k * n,
        transcendentals=0,
        bytes_accessed=(
            in_sz * (mp * kp * gn + kp * np_ * gm)
            + out_sz * mp * np_
            + (4 * np_ * gm if has_bias else 0)
        ),
    )

    kernel = _make_linear_kernel(has_bias, use_scratch)

    out2d = pl.pallas_call(
        kernel,
        out_shape=jax.ShapeDtypeStruct((mp, np_), out_dtype),
        grid_spec=pltpu.PrefetchScalarGridSpec(
            num_scalar_prefetch=0,
            grid=grid,
            in_specs=in_specs,
            out_specs=pl.BlockSpec((tm, tn), lambda i, j, kk: (i, j)),
            scratch_shapes=scratch,
        ),
        compiler_params=pltpu.CompilerParams(
            dimension_semantics=("parallel", "parallel", "arbitrary"),
            vmem_limit_bytes=vmem_limit,
        ),
        cost_estimate=cost,
    )(*args)

    if (mp, np_) != (m, n):
        out2d = out2d[:m, :n]
    return out2d.reshape(*orig_shape[:-1], n)


def linear_forward(x, weight, bias=None, compute_dtype=None):
    """One-shot convenience wrapper.  For a layer that is called repeatedly,
    call prepare_linear(...) once and reuse linear_apply(...) so the weight
    cast/transpose/pad is not re-materialized in HBM on every forward."""
    return linear_apply(x, prepare_linear(weight, bias, compute_dtype))


def init_linear_params(key, in_features, out_features, bias=True, dtype=jnp.float32):
    """xavier_uniform weight + zero bias (matches the module __init__)."""
    bound = math.sqrt(6.0 / (in_features + out_features))
    w = jax.random.uniform(
        key, (out_features, in_features), dtype=dtype, minval=-bound, maxval=bound
    )
    b = jnp.zeros((out_features,), dtype=jnp.float32) if bias else None
    return w, b


if __name__ == "__main__":
    key = jax.random.PRNGKey(0)
    k_w, k_x = jax.random.split(key)

    batch, seq, in_features, out_features = 2, 8, 32, 64

    weight, bias = init_linear_params(k_w, in_features, out_features, bias=True)
    x = jax.random.normal(k_x, (batch, seq, in_features), dtype=jnp.float32)

    y_ref = x @ weight.T + bias

    # 1) Prepared-weight path (intended per-layer usage), f32, with bias.
    prep = prepare_linear(weight, bias)
    y = jax.block_until_ready(linear_apply(x, prep))
    assert y.shape == (batch, seq, out_features)
    assert jnp.allclose(y, y_ref, atol=1e-5, rtol=1e-5)

    # 2) bias=False path (separate kernel, no zeros DMA / bias add).
    prep_nb = prepare_linear(weight, None)
    y_nb = jax.block_until_ready(linear_apply(x, prep_nb))
    assert jnp.allclose(y_nb, x @ weight.T, atol=1e-5, rtol=1e-5)

    # 3) One-off convenience wrapper.
    y_once = jax.block_until_ready(linear_forward(x, weight, bias))
    assert jnp.allclose(y_once, y_ref, atol=1e-5, rtol=1e-5)

    # 4) bf16 compute path (f32 accumulate; bf16 output exercises the scratch-
    #    accumulator kernel variant).
    prep_bf16 = prepare_linear(weight, bias, compute_dtype=jnp.bfloat16)
    y_bf16 = jax.block_until_ready(linear_apply(x.astype(jnp.bfloat16), prep_bf16))
    assert y_bf16.dtype == jnp.bfloat16
    assert jnp.allclose(y_bf16.astype(jnp.float32), y_ref, atol=1e-1, rtol=1e-1)

    print("KERNEL_OK")
</pallas_src>

<mosaic_0001>
module attributes {stable_mosaic.version = 11 : i64} {
  func.func @kernel(%arg0: i32, %arg1: i32, %arg2: i32, %arg3: memref<16x128xf32, #tpu.memory_space<vmem>>, %arg4: memref<128x128xf32, #tpu.memory_space<vmem>>, %arg5: memref<1x128xf32, #tpu.memory_space<vmem>>, %arg6: memref<16x128xf32, #tpu.memory_space<vmem>>) attributes {dimension_semantics = [#tpu.dimension_semantics<parallel>, #tpu.dimension_semantics<parallel>, #tpu.dimension_semantics<arbitrary>], iteration_bounds = array<i64: 1, 1, 1>, scalar_prefetch = 0 : i64, scratch_operands = 0 : i64, tpu.core_type = #tpu.core_type<tc>, window_params = [{transform_indices = @transform_0, window_bounds = array<i64: 16, 128>}, {transform_indices = @transform_1, window_bounds = array<i64: 128, 128>}, {transform_indices = @transform_2, window_bounds = array<i64: 1, 128>}, {transform_indices = @transform_3, window_bounds = array<i64: 16, 128>}]} {
    %c0_i32 = arith.constant 0 : i32
    %0 = arith.cmpi eq, %arg2, %c0_i32 : i32
    %1 = arith.extui %0 : i1 to i32
    %c0_i32_0 = arith.constant 0 : i32
    %2 = arith.cmpi ne, %1, %c0_i32_0 : i32
    scf.if %2 {
      %c0_8 = arith.constant 0 : index
      %c0_9 = arith.constant 0 : index
      %9 = vector.load %arg5[%c0_8, %c0_9] : memref<1x128xf32, #tpu.memory_space<vmem>>, vector<1x128xf32>
      %10 = vector.shape_cast %9 : vector<1x128xf32> to vector<1x128xf32>
      %11 = vector.broadcast %10 : vector<1x128xf32> to vector<16x128xf32>
      %c0_10 = arith.constant 0 : index
      %c0_11 = arith.constant 0 : index
      %12 = vector.load %arg6[%c0_10, %c0_11] : memref<16x128xf32, #tpu.memory_space<vmem>>, vector<16x128xf32>
      tpu.vector_store %arg6[%c0_10, %c0_11], %11 {strides = array<i32>} : memref<16x128xf32, #tpu.memory_space<vmem>>, vector<16x128xf32>,
    } else {
    }
    %c0 = arith.constant 0 : index
    %c0_1 = arith.constant 0 : index
    %3 = vector.load %arg6[%c0, %c0_1] : memref<16x128xf32, #tpu.memory_space<vmem>>, vector<16x128xf32>
    %c0_2 = arith.constant 0 : index
    %c0_3 = arith.constant 0 : index
    %4 = vector.load %arg3[%c0_2, %c0_3] : memref<16x128xf32, #tpu.memory_space<vmem>>, vector<16x128xf32>
    %c0_4 = arith.constant 0 : index
    %c0_5 = arith.constant 0 : index
    %5 = vector.load %arg4[%c0_4, %c0_5] : memref<128x128xf32, #tpu.memory_space<vmem>>, vector<128x128xf32>
    %cst = arith.constant dense<0.000000e+00> : vector<16x128xf32>
    %6 = tpu.matmul %4, %5, %cst {dimension_numbers = #tpu.dot_dimension_numbers<[1], [0], [0], [1], [0, 0, 1, 1], [], []>} : vector<16x128xf32>, vector<128x128xf32>, vector<16x128xf32> -> vector<16x128xf32>
    %7 = arith.addf %3, %6 : vector<16x128xf32>
    %c0_6 = arith.constant 0 : index
    %c0_7 = arith.constant 0 : index
    %8 = vector.load %arg6[%c0_6, %c0_7] : memref<16x128xf32, #tpu.memory_space<vmem>>, vector<16x128xf32>
    tpu.vector_store %arg6[%c0_6, %c0_7], %7 {strides = array<i32>} : memref<16x128xf32, #tpu.memory_space<vmem>>, vector<16x128xf32>,
    return
  }
  func.func @transform_0(%arg0: i32, %arg1: i32, %arg2: i32) -> (i32, i32) {
    %c0_i32 = arith.constant 0 : i32
    return %arg0, %arg2 : i32, i32
  }
  func.func @transform_1(%arg0: i32, %arg1: i32, %arg2: i32) -> (i32, i32) {
    %c0_i32 = arith.constant 0 : i32
    return %arg2, %arg1 : i32, i32
  }
  func.func @transform_2(%arg0: i32, %arg1: i32, %arg2: i32) -> (i32, i32) {
    %c0_i32 = arith.constant 0 : i32
    %c0_i32_0 = arith.constant 0 : i32
    return %c0_i32, %arg1 : i32, i32
  }
  func.func @transform_3(%arg0: i32, %arg1: i32, %arg2: i32) -> (i32, i32) {
    %c0_i32 = arith.constant 0 : i32
    return %arg0, %arg1 : i32, i32
  }
}

</mosaic_0001>

<bundles_post_ra>
// kernel: tpu_custom_call.1
= control target key start
LH: loop header
LB: loop body
LE: loop exit
PB: predicated region body
PF: predicated region fallthrough
CT: control target
= control target key end

     0   :  { %8 = vsyncpa [#allocation3], 0  ;;  %s409_s0 = inlined_call_operand.hbm [shape: f32[16,128], index: 0, kind: input, shape index: {}]   ;;  %s410_s1 = inlined_call_operand.hbm [shape: f32[128,128], index: 1, kind: input, shape index: {}]   ;;  %s411_s2 = inlined_call_operand.vmem [shape: f32[1,128], index: 2, kind: input, shape index: {}]   ;;  %s412_s3 = inlined_call_operand.hbm [shape: f32[16,128], index: 3, kind: output, shape index: {}]  }
   0x1   :  { %9 = vsyncpa [#allocation6], 0 }
   0x2   :  { %10 = vsyncpa [#allocation4], 0  ;;  %s336_s12 = smov [#allocation2]   ;;  %s264_s16 = scalar_lea.hbm %s409_s0, 256 }
   0x3   :  { %s16_s13 = sshll.u32 %s336_s12, 4  ;;  %p265_p0 = scmp.ne.s32.totalorder %s409_s0, %s264_s16  ;;  %s17_s13 = int_to_ptr.vmem [resolvable:$true] %s16_s13 }
   0x4   :  { %p268_p1 = scmp.lt.u32.totalorder %s264_s16, %s409_s0 }
   0x6   :  { %p270_p2 = pnand %p268_p1, %p265_p0 }
   0x8   :  { %273 = shalt.err (!%p270_p2)
}
   0x9   :  { %s274_s21 = scalar_lea.vmem %s17_s13, 256  ;;  %p279_p4 = scmp.lt.s32.totalorder %s17_s13, %s17_s13 }
   0xa   :  { %p275_p3 = scmp.ne.s32.totalorder %s17_s13, %s274_s21  ;;  %p280_p5 = scmp.lt.s32.totalorder %s274_s21, %s274_s21 }
   0xc   :  { %p281_p6 = por %p280_p5, %p279_p4 }
   0xe   :  { %p282_p7 = pnand %p281_p6, %p275_p3 }
  0x10   :  { %285 = shalt.err (!%p282_p7)
}
  0x11   :  { %s337_s22 = smov 128   ;;  %s338_s23 = smov 8  }
  0x12   :  { %22 = dma.hbm_to_vmem [thread:$0]  %s409_s0, 256, %s17_s13, [#allocation3], %s337_s22, %s337_s22, %s338_s23  }
  0x13   :  { %s339_s26 = smov [#allocation5]   ;;  %s286_s30 = scalar_lea.hbm %s410_s1, 2048 }
  0x14   :  { %s28_s27 = sshll.u32 %s339_s26, 4  ;;  %p287_p8 = scmp.ne.s32.totalorder %s410_s1, %s286_s30  ;;  %s29_s27 = int_to_ptr.vmem [resolvable:$true] %s28_s27 }
  0x15   :  { %p290_p9 = scmp.lt.u32.totalorder %s286_s30, %s410_s1 }
  0x17   :  { %p292_p10 = pnand %p290_p9, %p287_p8 }
  0x19   :  { %295 = shalt.err (!%p292_p10)
}
  0x1a   :  { %s296_s8 = scalar_lea.vmem %s29_s27, 2048  ;;  %p301_p12 = scmp.lt.s32.totalorder %s29_s27, %s29_s27 }
  0x1b   :  { %p297_p11 = scmp.ne.s32.totalorder %s29_s27, %s296_s8  ;;  %p302_p13 = scmp.lt.s32.totalorder %s296_s8, %s296_s8 }
  0x1d   :  { %p303_p0 = por %p302_p13, %p301_p12 }
  0x1f   :  { %p304_p1 = pnand %p303_p0, %p297_p11 }
  0x21   :  { %307 = shalt.err (!%p304_p1)
}
  0x22   :  { %34 = dma.hbm_to_vmem [thread:$0]  %s410_s1, 2048, %s29_s27, [#allocation6], %s337_s22, %s337_s22, %s338_s23  }
  0x23   :  { %330 = dma.done.wait [#allocation3], 256  }
  0x24   :  { %331 = vsyncadd [#allocation3], 4294967040 }
  0x25   :  { %332 = dma.done.wait [#allocation6], 2048  }
  0x26   :  { %333 = vsyncadd [#allocation6], 4294965248  ;;  %v60_v0 = vld [vmem:[#allocation5] sm:$0xff]  ;;  %v61_v1 = vld [vmem:[#allocation5 + $0x8] sm:$0xff]  ;;  %s340_s11 = smov [#allocation7]  }
  0x27   :  { %v62_v2 = vld [vmem:[#allocation5 + $0x10] sm:$0xff]  ;;  %v227_v3 = vpack.c.bf16 %v61_v1, %v60_v0  ;;  %v63_v4 = vld [vmem:[#allocation5 + $0x18] sm:$0xff]  ;;  %v64_v6 = vld [vmem:[#allocation5 + $0x20] sm:$0xff]  ;;  %s160_s12 = sshll.u32 %s340_s11, 4  ;;  %s161_s12 = int_to_ptr.vmem [resolvable:$true] %s160_s12 }
  0x28   :  { %v231_v5 = vpack.c.bf16 %v63_v4, %v62_v2  ;;  %v65_v7 = vld [vmem:[#allocation5 + $0x28] sm:$0xff]  ;;  %v58_v9 = vld [vmem:[#allocation2] sm:$0xff]  ;;  %v67_v11 = vld [vmem:[#allocation5 + $0x38] sm:$0xff]  ;;  %s308_s13 = scalar_lea.vmem %s161_s12, 256  ;;  %p313_p3 = scmp.lt.s32.totalorder %s161_s12, %s161_s12 }
  0x29   :  { %228 = vmatprep.subr.bf16.mxu0 %v227_v3  ;;  %v235_v8 = vpack.c.bf16 %v65_v7, %v64_v6  ;;  %v66_v10 = vld [vmem:[#allocation5 + $0x30] sm:$0xff]  ;;  %224 = vmatprep.mubr.f32.mxu0 %v58_v9  ;;  %v68_v13 = vld [vmem:[#allocation5 + $0x40] sm:$0xff]  ;;  %v69_v14 = vld [vmem:[#allocation5 + $0x48] sm:$0xff]  ;;  %p309_p2 = scmp.ne.s32.totalorder %s161_s12, %s308_s13  ;;  %p314_p4 = scmp.lt.s32.totalorder %s308_s13, %s308_s13 }
  0x2a   :  { %230 = vmatpush3.bf16.msra.mxu0 %v227_v3  ;;  %v239_v12 = vpack.c.bf16 %v67_v11, %v66_v10  ;;  %v243_v15 = vpack.c.bf16 %v69_v14, %v68_v13  ;;  %v70_v16 = vld [vmem:[#allocation5 + $0x50] sm:$0xff]  ;;  %v71_v17 = vld [vmem:[#allocation5 + $0x58] sm:$0xff]  ;;  %v72_v19 = vld [vmem:[#allocation5 + $0x60] sm:$0xff] }
  0x2b   :  { %232 = vmatprep.subr.bf16.mxu0 %v231_v5  ;;  %v247_v18 = vpack.c.bf16 %v71_v17, %v70_v16  ;;  %v73_v20 = vld [vmem:[#allocation5 + $0x68] sm:$0xff]  ;;  %v74_v22 = vld [vmem:[#allocation5 + $0x70] sm:$0xff]  ;;  %v75_v23 = vld [vmem:[#allocation5 + $0x78] sm:$0xff]  ;;  %p315_p5 = por %p314_p4, %p313_p3 }
  0x2c   :  { %v251_v21 = vpack.c.bf16 %v73_v20, %v72_v19  ;;  %v255_v24 = vpack.c.bf16 %v75_v23, %v74_v22  ;;  %v59_v25 = vld [vmem:[#allocation2 + $0x8] sm:$0xff]  ;;  %v173_v26 = vld [vmem:[%s411_s2] ss:$0 sm:$0xff] }
  0x2d   :  { %p316_p6 = pnand %p315_p5, %p309_p2 }
  0x2e   :  { %234 = vmatpush3.bf16.msra.mxu0 %v231_v5 }
  0x2f   :  { %236 = vmatprep.subr.bf16.mxu0 %v235_v8 }
  0x32   :  { %238 = vmatpush3.bf16.msra.mxu0 %v235_v8 }
  0x33   :  { %240 = vmatprep.subr.bf16.mxu0 %v239_v12 }
  0x36   :  { %242 = vmatpush3.bf16.msra.mxu0 %v239_v12 }
  0x37   :  { %244 = vmatprep.subr.bf16.mxu0 %v243_v15 }
  0x3a   :  { %246 = vmatpush3.bf16.msra.mxu0 %v243_v15 }
  0x3b   :  { %248 = vmatprep.subr.bf16.mxu0 %v247_v18 }
  0x3e   :  { %250 = vmatpush3.bf16.msra.mxu0 %v247_v18 }
  0x3f   :  { %252 = vmatprep.subr.bf16.mxu0 %v251_v21 }
  0x42   :  { %254 = vmatpush3.bf16.msra.mxu0 %v251_v21 }
  0x43   :  { %256 = vmatprep.subr.bf16.mxu0 %v255_v24 }
  0x46   :  { %258 = vmatpush3.bf16.msra.mxu0 %v255_v24 }
  0x49   :  { %225 = vmatmul.mubr.f32.vlgmr.msra.gmra.mrb[0].mxu0 %v59_v25 }
 0x11c   :  { %v226_v27 = vpop.f32.mrb[0].mxu0 }
 0x11d   :  { %v152_v28 = vadd.f32 %v226_v27, %v173_v26  ;;  %v142_v29 = vpop.f32.mrb[1].mxu0 }
 0x11e   :  { %v151_v30 = vadd.f32 %v173_v26, %v142_v29 }
 0x11f   :  { %154 = vst [vmem:[#allocation7 + $0x8] sm:$0xff] %v152_v28 }
 0x120   :  { %153 = vst [vmem:[#allocation7] sm:$0xff] %v151_v30 }
 0x121   :  { %319 = shalt.err (!%p316_p6)
}
 0x122   :  { %s320_s2 = scalar_lea.hbm %s412_s3, 256 }
 0x123   :  { %p321_p7 = scmp.ne.s32.totalorder %s412_s3, %s320_s2  ;;  %p324_p8 = scmp.lt.u32.totalorder %s320_s2, %s412_s3 }
 0x125   :  { %p326_p9 = pnand %p324_p8, %p321_p7 }
 0x127   :  { %329 = shalt.err (!%p326_p9)
}
 0x128   :  { %166 = dma.vmem_to_hbm [thread:$0]  %s161_s12, 256, %s412_s3, [#allocation4], %s337_s22, %s337_s22, %s338_s23  }
 0x129   :  { %334 = dma.done.wait [#allocation4], 256  }
 0x12a   :  { %335 = vsyncadd [#allocation4], 4294967040 }
 0x12b   :  { %170 = vsyncpa [#allocation3], 1 }
 0x12c   :  { %171 = vsyncpa [#allocation6], 1 }
 0x12d   :  { %172 = vsyncpa [#allocation4], 1 }

</bundles_post_ra>
